<compile_context>
chip_gen: v7x
topology: tpu7x:2x2x1
jax: 0.10.0
libtpu: 0.0.40
codegen_flags: <defaults>
</compile_context>

<pallas_src>
import jax
import jax.numpy as jnp
from jax.experimental import pallas as pl
from jax.experimental.pallas import tpu as pltpu


def _editor_out_kernel(x_ref, w1_ref, b1_ref, w2_ref, b2_ref, out_ref):
    # x_ref: (1, C_in, hw_tile); weights/biases are full (channels on sublanes).
    x = x_ref[0]                                                  # (C_in, hw)
    # conv1 (mask + bias already folded into w1_eff / b1_eff) == edited act.
    edited = jnp.dot(w1_ref[...], x,
                     preferred_element_type=jnp.float32) + b1_ref[...]
    # rest of the model: relu -> conv2
    h = jnp.maximum(edited, 0.0)
    out_ref[0] = jnp.dot(w2_ref[...], h,
                         preferred_element_type=jnp.float32) + b2_ref[...]


def _editor_act_kernel(x_ref, w1_ref, b1_ref, edited_ref):
    # Only the hooked layer's edited activation is needed in this mode.
    x = x_ref[0]                                                  # (C_in, hw)
    edited_ref[0] = jnp.dot(w1_ref[...], x,
                            preferred_element_type=jnp.float32) + b1_ref[...]


_LANE = 128
_VMEM_BUDGET_BYTES = 8 * 1024 * 1024   # under v5e's 16 MiB default scoped VMEM
_MAX_TILE_PIXELS = 32 * 1024           # ~1 MiB f32 x-buffer; HBM roofline saturated


def _pad8(c):
    return ((c + 7) // 8) * 8


def _pick_hw_tile(HW_pad, N, C_in, C_mid, C_out,
                  vmem_budget_bytes=_VMEM_BUDGET_BYTES,
                  cap_pixels=_MAX_TILE_PIXELS):
    """Pick a pixel-tile size (multiple of 128 dividing HW_pad).

    Per-pixel VMEM bytes account for 8-sublane padding of the tiny channel
    dims, the double-buffered x and out pipeline tiles, and the f32
    intermediates (edited, h) live inside the kernel. Also keeps >=2 tiles
    along HW (and >=4 total grid steps where HW allows) so both v7x
    TensorCores get work and prologue/epilogue DMA stays overlapped.
    """
    bytes_per_pixel = 4 * 2 * (_pad8(C_in) + _pad8(max(C_mid, C_out)) + _pad8(C_mid))
    max_pixels = min(cap_pixels, max(_LANE, vmem_budget_bytes // bytes_per_pixel))
    want_splits = max(2, -(-4 // max(N, 1)))          # ceil(4 / N), at least 2
    if HW_pad >= want_splits * _LANE:
        max_pixels = min(max_pixels, HW_pad // want_splits)
    if HW_pad <= _LANE:
        return HW_pad
    t = max(_LANE, (max_pixels // _LANE) * _LANE)
    while t > _LANE and HW_pad % t != 0:              # HW_pad is a multiple of 128,
        t -= _LANE                                    # so t=128 always terminates this
    return t


def neuro_activation_editor_forward(x_nchw, w1, b1, mask_c, w2, b2,
                                    return_activations=False, *, hw_tile=None):
    """Run the hooked model forward.

    x_nchw : [N, C_in, H, W] float32
    w1     : [C_mid, C_in]   (torch conv1.weight[:, :, 0, 0])
    b1     : [C_mid]
    mask_c : [C_mid]         (torch mask of shape (1, C_mid, 1, 1))
    w2     : [C_out, C_mid]  (torch conv2.weight[:, :, 0, 0])
    b2     : [C_out]

    Returns the final model output (NCHW) when return_activations=False, or the
    edited-activation dict {"conv1": NCHW activation} when True — mirroring the
    PyTorch module's forward.
    """
    N, C_in, H, W = x_nchw.shape
    C_mid = w1.shape[0]
    C_out = w2.shape[0]
    HW = H * W

    # Native layout: NCHW viewed as [N, C, H*W] — pure reshape, no transpose.
    x_rows = x_nchw.reshape(N, C_in, HW)

    # Pad the pixel axis to a multiple of 128 so tiles stay lane-dense and the
    # pipelined path is kept even for ragged H*W; padding is sliced off below.
    HW_pad = -(-HW // _LANE) * _LANE
    if HW_pad != HW:
        x_rows = jnp.pad(x_rows, ((0, 0), (0, 0), (0, HW_pad - HW)))

    if hw_tile is None:
        hw_tile = _pick_hw_tile(HW_pad, N, C_in, C_mid, C_out)
    assert HW_pad % hw_tile == 0, "hw_tile must divide the 128-padded pixel count"

    # Fold the per-channel editing mask into conv1's weight and bias:
    #   (x @ w1 + b1) * mask == x @ (w1 * mask) + (b1 * mask)
    w1_eff = w1 * mask_c[:, None]
    b1_eff = (b1 * mask_c).reshape(C_mid, 1)
    b2_2d = b2.reshape(C_out, 1)

    grid = (N, HW_pad // hw_tile)
    cparams = pltpu.CompilerParams(
        dimension_semantics=("parallel", "parallel"),
        vmem_limit_bytes=32 * 1024 * 1024)

    x_spec = pl.BlockSpec((1, C_in, hw_tile), lambda n, t: (n, 0, t))
    w1_spec = pl.BlockSpec((C_mid, C_in), lambda n, t: (0, 0))
    b1_spec = pl.BlockSpec((C_mid, 1), lambda n, t: (0, 0))

    if return_activations:
        cost = pl.CostEstimate(
            flops=2 * N * HW_pad * C_in * C_mid,
            transcendentals=0,
            bytes_accessed=4 * N * HW_pad * (C_in + C_mid))
        edited = pl.pallas_call(
            _editor_act_kernel,
            out_shape=jax.ShapeDtypeStruct((N, C_mid, HW_pad), jnp.float32),
            grid_spec=pltpu.PrefetchScalarGridSpec(
                num_scalar_prefetch=0,
                grid=grid,
                in_specs=[x_spec, w1_spec, b1_spec],
                out_specs=pl.BlockSpec((1, C_mid, hw_tile),
                                       lambda n, t: (n, 0, t)),
            ),
            compiler_params=cparams,
            cost_estimate=cost,
        )(x_rows, w1_eff, b1_eff)
        return {"conv1": edited[..., :HW].reshape(N, C_mid, H, W)}

    cost = pl.CostEstimate(
        flops=2 * N * HW_pad * (C_in * C_mid + C_mid * C_out),
        transcendentals=0,
        bytes_accessed=4 * N * HW_pad * (C_in + C_out))
    out = pl.pallas_call(
        _editor_out_kernel,
        out_shape=jax.ShapeDtypeStruct((N, C_out, HW_pad), jnp.float32),
        grid_spec=pltpu.PrefetchScalarGridSpec(
            num_scalar_prefetch=0,
            grid=grid,
            in_specs=[
                x_spec,
                w1_spec,
                b1_spec,
                pl.BlockSpec((C_out, C_mid), lambda n, t: (0, 0)),
                pl.BlockSpec((C_out, 1), lambda n, t: (0, 0)),
            ],
            out_specs=pl.BlockSpec((1, C_out, hw_tile), lambda n, t: (n, 0, t)),
        ),
        compiler_params=cparams,
        cost_estimate=cost,
    )(x_rows, w1_eff, b1_eff, w2, b2_2d)
    return out[..., :HW].reshape(N, C_out, H, W)


def _reference(x_nchw, w1, b1, mask_c, w2, b2):
    # pure-JAX reference of the same hooked forward (NCHW, 1x1 convs)
    h1 = jnp.einsum('nchw,mc->nmhw', x_nchw, w1) + b1[None, :, None, None]
    edited = h1 * mask_c[None, :, None, None]
    h = jnp.maximum(edited, 0.0)
    out = jnp.einsum('nmhw,om->nohw', h, w2) + b2[None, :, None, None]
    return out, edited


if __name__ == "__main__":
    key = jax.random.PRNGKey(0)
    kx, k1, kb1, km, k2, kb2, kx2 = jax.random.split(key, 7)

    N, C_in, H, W = 2, 4, 16, 16
    C_mid, C_out = 8, 4

    x = jax.random.normal(kx, (N, C_in, H, W), dtype=jnp.float32)
    w1 = jax.random.normal(k1, (C_mid, C_in), dtype=jnp.float32) * 0.1
    b1 = jax.random.normal(kb1, (C_mid,), dtype=jnp.float32) * 0.1
    # editing mask (per-channel, like a torch mask of shape (1, C_mid, 1, 1))
    mask = (jax.random.uniform(km, (C_mid,)) > 0.5).astype(jnp.float32)
    w2 = jax.random.normal(k2, (C_out, C_mid), dtype=jnp.float32) * 0.1
    b2 = jax.random.normal(kb2, (C_out,), dtype=jnp.float32) * 0.1

    # return_activations=False path: final model output only
    out = neuro_activation_editor_forward(
        x, w1, b1, mask, w2, b2, return_activations=False)
    out = jax.block_until_ready(out)

    # return_activations=True path: edited (hooked) activation only
    acts = neuro_activation_editor_forward(
        x, w1, b1, mask, w2, b2, return_activations=True)
    acts = jax.block_until_ready(acts)
    edited = acts["conv1"]

    # correctness check vs pure-JAX reference
    ref_out, ref_act = _reference(x, w1, b1, mask, w2, b2)
    assert jnp.allclose(out, ref_out, atol=1e-5, rtol=1e-5)
    assert jnp.allclose(edited, ref_act, atol=1e-5, rtol=1e-5)

    # ragged H*W (pixel count not a multiple of 128) exercises the padded path
    xr = jax.random.normal(kx2, (1, C_in, 10, 10), dtype=jnp.float32)
    out_r = jax.block_until_ready(neuro_activation_editor_forward(
        xr, w1, b1, mask, w2, b2, return_activations=False))
    ref_out_r, _ = _reference(xr, w1, b1, mask, w2, b2)
    assert jnp.allclose(out_r, ref_out_r, atol=1e-5, rtol=1e-5)

    print("KERNEL_OK")
</pallas_src>

<mosaic_0001>
module attributes {stable_mosaic.version = 11 : i64} {
  func.func @_editor_out_kernel(%arg0: i32, %arg1: i32, %arg2: memref<1x4x128xf32, #tpu.memory_space<vmem>>, %arg3: memref<8x4xf32, #tpu.memory_space<vmem>>, %arg4: memref<8x1xf32, #tpu.memory_space<vmem>>, %arg5: memref<4x8xf32, #tpu.memory_space<vmem>>, %arg6: memref<4x1xf32, #tpu.memory_space<vmem>>, %arg7: memref<1x4x128xf32, #tpu.memory_space<vmem>>) attributes {dimension_semantics = [#tpu.dimension_semantics<parallel>, #tpu.dimension_semantics<parallel>], iteration_bounds = array<i64: 2, 2>, scalar_prefetch = 0 : i64, scratch_operands = 0 : i64, tpu.core_type = #tpu.core_type<tc>, window_params = [{transform_indices = @transform_0, window_bounds = array<i64: 1, 4, 128>}, {pipeline_mode = #tpu.pipeline_mode<synchronous>, transform_indices = @transform_1, window_bounds = array<i64: 8, 4>}, {pipeline_mode = #tpu.pipeline_mode<synchronous>, transform_indices = @transform_2, window_bounds = array<i64: 8, 1>}, {pipeline_mode = #tpu.pipeline_mode<synchronous>, transform_indices = @transform_3, window_bounds = array<i64: 4, 8>}, {pipeline_mode = #tpu.pipeline_mode<synchronous>, transform_indices = @transform_4, window_bounds = array<i64: 4, 1>}, {transform_indices = @transform_5, window_bounds = array<i64: 1, 4, 128>}]} {
    %c0 = arith.constant 0 : index
    %c0_0 = arith.constant 0 : index
    %c0_1 = arith.constant 0 : index
    %0 = vector.load %arg2[%c0, %c0_0, %c0_1] : memref<1x4x128xf32, #tpu.memory_space<vmem>>, vector<1x4x128xf32>
    %1 = vector.shape_cast %0 : vector<1x4x128xf32> to vector<4x128xf32>
    %c0_2 = arith.constant 0 : index
    %c0_3 = arith.constant 0 : index
    %2 = vector.load %arg3[%c0_2, %c0_3] : memref<8x4xf32, #tpu.memory_space<vmem>>, vector<8x4xf32>
    %cst = arith.constant dense<0.000000e+00> : vector<8x128xf32>
    %3 = tpu.matmul %2, %1, %cst {dimension_numbers = #tpu.dot_dimension_numbers<[1], [0], [0], [1], [0, 0, 1, 1], [], []>} : vector<8x4xf32>, vector<4x128xf32>, vector<8x128xf32> -> vector<8x128xf32>
    %c0_4 = arith.constant 0 : index
    %c0_5 = arith.constant 0 : index
    %4 = vector.load %arg4[%c0_4, %c0_5] : memref<8x1xf32, #tpu.memory_space<vmem>>, vector<8x1xf32>
    %5 = vector.broadcast %4 : vector<8x1xf32> to vector<8x128xf32>
    %6 = arith.addf %3, %5 : vector<8x128xf32>
    %cst_6 = arith.constant 0.000000e+00 : f32
    %7 = vector.broadcast %cst_6 : f32 to vector<8x128xf32>
    %8 = arith.maximumf %6, %7 : vector<8x128xf32>
    %c0_7 = arith.constant 0 : index
    %c0_8 = arith.constant 0 : index
    %9 = vector.load %arg5[%c0_7, %c0_8] : memref<4x8xf32, #tpu.memory_space<vmem>>, vector<4x8xf32>
    %cst_9 = arith.constant dense<0.000000e+00> : vector<4x128xf32>
    %10 = tpu.matmul %9, %8, %cst_9 {dimension_numbers = #tpu.dot_dimension_numbers<[1], [0], [0], [1], [0, 0, 1, 1], [], []>} : vector<4x8xf32>, vector<8x128xf32>, vector<4x128xf32> -> vector<4x128xf32>
    %c0_10 = arith.constant 0 : index
    %c0_11 = arith.constant 0 : index
    %11 = vector.load %arg6[%c0_10, %c0_11] : memref<4x1xf32, #tpu.memory_space<vmem>>, vector<4x1xf32>
    %12 = vector.broadcast %11 : vector<4x1xf32> to vector<4x128xf32>
    %13 = arith.addf %10, %12 : vector<4x128xf32>
    %c0_12 = arith.constant 0 : index
    %c0_13 = arith.constant 0 : index
    %c0_14 = arith.constant 0 : index
    %14 = vector.load %arg7[%c0_12, %c0_13, %c0_14] : memref<1x4x128xf32, #tpu.memory_space<vmem>>, vector<1x4x128xf32>
    %15 = vector.shape_cast %14 : vector<1x4x128xf32> to vector<4x128xf32>
    %16 = vector.shape_cast %13 : vector<4x128xf32> to vector<1x4x128xf32>
    tpu.vector_store %arg7[%c0_12, %c0_13, %c0_14], %16 {strides = array<i32>} : memref<1x4x128xf32, #tpu.memory_space<vmem>>, vector<1x4x128xf32>,
    return
  }
  func.func @transform_0(%arg0: i32, %arg1: i32) -> (i32, i32, i32) {
    %c0_i32 = arith.constant 0 : i32
    %c0_i32_0 = arith.constant 0 : i32
    return %arg0, %c0_i32, %arg1 : i32, i32, i32
  }
  func.func @transform_1(%arg0: i32, %arg1: i32) -> (i32, i32) {
    %c0_i32 = arith.constant 0 : i32
    %c0_i32_0 = arith.constant 0 : i32
    %c0_i32_1 = arith.constant 0 : i32
    return %c0_i32, %c0_i32_0 : i32, i32
  }
  func.func @transform_2(%arg0: i32, %arg1: i32) -> (i32, i32) {
    %c0_i32 = arith.constant 0 : i32
    %c0_i32_0 = arith.constant 0 : i32
    %c0_i32_1 = arith.constant 0 : i32
    return %c0_i32, %c0_i32_0 : i32, i32
  }
  func.func @transform_3(%arg0: i32, %arg1: i32) -> (i32, i32) {
    %c0_i32 = arith.constant 0 : i32
    %c0_i32_0 = arith.constant 0 : i32
    %c0_i32_1 = arith.constant 0 : i32
    return %c0_i32, %c0_i32_0 : i32, i32
  }
  func.func @transform_4(%arg0: i32, %arg1: i32) -> (i32, i32) {
    %c0_i32 = arith.constant 0 : i32
    %c0_i32_0 = arith.constant 0 : i32
    %c0_i32_1 = arith.constant 0 : i32
    return %c0_i32, %c0_i32_0 : i32, i32
  }
  func.func @transform_5(%arg0: i32, %arg1: i32) -> (i32, i32, i32) {
    %c0_i32 = arith.constant 0 : i32
    %c0_i32_0 = arith.constant 0 : i32
    return %arg0, %c0_i32, %arg1 : i32, i32, i32
  }
}

</mosaic_0001>

<bundles_post_ra>
// kernel: tpu_custom_call.1
= control target key start
LH: loop header
LB: loop body
LE: loop exit
PB: predicated region body
PF: predicated region fallthrough
CT: control target
= control target key end

     0   :  { %10 = vsyncpa [#allocation3], 0  ;;  %s895_s0 = inlined_call_operand.vmem [shape: f32[2,4,256], index: 0, kind: input, shape index: {}]   ;;  %s896_s1 = inlined_call_operand.vmem [shape: f32[8,4], index: 1, kind: input, shape index: {}]   ;;  %s897_s2 = inlined_call_operand.vmem [shape: f32[8,1], index: 2, kind: input, shape index: {}]   ;;  %s898_s3 = inlined_call_operand.vmem [shape: f32[4,8], index: 3, kind: input, shape index: {}]   ;;  %s899_s4 = inlined_call_operand.vmem [shape: f32[4,1], index: 4, kind: input, shape index: {}]   ;;  %s900_s5 = inlined_call_operand.hbm [shape: f32[2,4,256], index: 5, kind: output, shape index: {}]  }
   0x1   :  { %12 = vsyncpa [#allocation3 + $0x1], 0  ;;  %s746_s18 = smov 0   ;;  %s748_s19 = smov 0  }
   0x2   :  { %s750_s20 = smov 0   ;;  %s752_s21 = smov 0  }
   0x3   :  { %s754_s22 = smov 0   ;;  %s756_s23 = smov 0  }
   0x4   :  { %s758_s24 = smov 0   ;;  %s760_s25 = smov 0  }
   0x5 LB: > { %s511_s26 = sadd.s32 4294967295, %s710_s25   ;;  %s512_s27 = sadd.s32 4294967294, %s710_s25   ;;  %s710_s25 = sphi %s760_s25, %s18_s25   ;;  %s706_s24 = sphi %s758_s24, %s909_s24   ;;  %s702_s23 = sphi %s756_s23, %s908_s23   ;;  %s698_s22 = sphi %s754_s22, %s907_s22   ;;  %s694_s21 = sphi %s752_s21, %s906_s21   ;;  %s690_s20 = sphi %s750_s20, %s905_s20   ;;  %s686_s19 = sphi %s748_s19, %s904_s19   ;;  %s682_s18 = sphi %s746_s18, %s903_s18  }
   0x6   : > { %s27_s28 = sadd.s32 1, %s702_s23  ;;  %s30_s29 = sadd.s32 1, %s706_s24 }
   0x7   : > { %p28_p0 = scmp.ge.s32.totalorder %s27_s28, 2  ;;  %p161_p1 = scmp.ne.s32.totalorder %s690_s20, %s686_s19 }
   0x8   : > { %p162_p2 = scmp.eq.s32.totalorder %s511_s26, 3  ;;  %p167_p5 = scmp.ne.s32.totalorder %s686_s19, %s682_s18 }
   0x9   : > { %s911_s28 = smov (%p28_p0, %s27_s28), 0  ;;  %s913_s29 = smov (!%p28_p0, %s30_s29), %s706_s24 }
   0xa   : > { %s147_s30 = ssub.s32 %s702_s23, %s911_s28  ;;  %p797_p3 = por %p162_p2, %p161_p1 }
   0xb   : > { %p32_p4 = scmp.ge.s32.totalorder %s913_s29, 2  ;;  %p168_p6 = scmp.eq.s32.totalorder %s512_s27, 3 }
   0xc   : > { %p515_p7 = scmp.ge.s32.totalorder %s710_s25, 1  ;;  %p209_p9 = scmp.lt.s32.totalorder %s710_s25, 5 }
   0xd   : > { %s915_s29 = smov (%p32_p4, %s913_s29), 0  ;;  %p806_p8 = por %p168_p6, %p167_p5 }
   0xe   : > { %s146_s8 = ssub.s32 %s706_s24, %s915_s29  ;;  %s151_s9 = sadd.s32 1, %s690_s20 }
   0xf   : > { %s148_s10 = sor.u32 %s147_s30, %s146_s8  ;;  %p210_p10 = pnand %p515_p7, %p209_p9 }
  0x10   : > { %p149_p11 = scmp.eq.s32.totalorder %s148_s10, 0  ;;  %p240_p12 = scmp.lt.s32.totalorder (!%p210_p10), %s698_s22, 1  ;;  %v712_v0 = vmov (!%p210_p10), 0.0   ;;  %vm713_vm0 = vmmov (!%p210_p10), 0   ;;  %v250_v1 = vld [vmem:[%s897_s2] sm:$0xff] (!%p210_p10)  ;;  %v714_v2 = vmov (!%p210_p10), 0  }
  0x11   : > { %213 = sbr.rel (%p210_p10) target bundleno = 477 (0x1dd), region = 40  ;;  %p242_p13 = scmp.lt.s32.totalorder (!%p210_p10), %s694_s21, 1  ;;  %531 = vmatprep.subr.mxu0 (!%p210_p10), %v712_v0  ;;  %533 = vmatprep.mubr.msk.f32.mxu0 (!%p210_p10), %vm713_vm0, %v712_v0  ;;  %v336_v3 = vld [vmem:[%s899_s4] sm:$0xf] (!%p210_p10)  ;;  %vm260_vm1 = vcmask (!%p210_p10), 1043456   ;;  %vm256_vm2 = vcmask (!%p210_p10), 31744  }
  0x12   : > { %s815_s11 = scalar_select %p149_p11, %s690_s20, %s151_s9  }
  0x13   : > { %615 = vset.pattern.permute.xlu0 (!%p210_p10), %v714_v2  ;;  %536 = vmatprep.subr.mxu1 (!%p210_p10), %v712_v0  ;;  %v249_v4 = vld [vmem:[%s896_s1] sm:$0xff] (!%p210_p10)  ;;  %vm342_vm3 = vcmask (!%p210_p10), 64512   ;;  %s523_s26 = sshll.u32 (!%p210_p10), %s698_s22, 1 }
  0x14   : > { %253 = vperm.xlu0 (!%p210_p10), %615, %v250_v1   ;;  %538 = vmatprep.mubr.msk.f32.mxu1 (!%p210_p10), %vm713_vm0, %v712_v0  ;;  %v335_v11 = vld [vmem:[%s898_s3] sm:$0xf] (!%p210_p10) }
  0x18   : > { %s241_s14 = scalar_select %p240_p12, %s698_s22, 1  ;;  %339 = vperm.xlu0 %615, %v336_v3  }
  0x19   : > { %s243_s15 = scalar_select %p242_p13, %s694_s21, 1 }
  0x1a   : > { %s517_s16 = sshll.u32 %s241_s14, 1  ;;  %s715_s14 = smov [#allocation2]  }
  0x1b   : > { %s245_s27 = sadd.s32 %s517_s16, %s243_s15  ;;  %s237_s16 = sand.u32 1, %s686_s19  }
  0x1c   : > { %s518_s30 = sshll.u32 %s245_s27, 2  ;;  %s516_s17 = sshll.u32 %s237_s16, 2 }
  0x1d   : > { %s247_s10 = scalar_lea.vmem %s895_s0, %s518_s30  ;;  %s429_s27 = sadd.s32 %s694_s21, %s523_s26 }
  0x1e   : > { %v248_v5 = vld [vmem:[%s247_s10] sm:$0xf]  ;;  %s524_s30 = sshll.u32 %s429_s27, 6  ;;  %s239_s8 = scalar_lea.vmem [#allocation2], %s516_s17 }
  0x1f   : > { %532 = vmatpush3.msk.msra.mxu0 %vm260_vm1, %v248_v5  ;;  %s433_s9 = sshll.u32 %s239_s8, 4  ;;  %s842_s13 = scalar_lea.hbm %s900_s5, %s524_s30  ;;  %s844_s9 = int_to_ptr.vmem [resolvable:$true] %s433_s9 }
  0x20   : > { %534 = vmatmul.mubr.msk.f32.vlgmr.msra.gmra.mrb[0].mxu0 %vm256_vm2, %v249_v4  ;;  %s418_s22 = scalar_lea.sflag [#allocation3], %s237_s16  ;;  %s616_s21 = scalar_lea.vmem %s844_s9, 64 }
  0x21   : > { %p617_p0 = scmp.ne.s32.totalorder %s844_s9, %s616_s21  ;;  %s620_s15 = sshll.u32 %s715_s14, 4  ;;  %s621_s15 = int_to_ptr.vmem [resolvable:$false] %s620_s15 }
  0x22   : > { %s622_s17 = scalar_lea.vmem %s621_s15, 128  ;;  %p623_p4 = scmp.lt.s32.totalorder %s844_s9, %s621_s15 }
  0x23   : > { %p618_p1 = pnand %p617_p0, %p797_p3  ;;  %p624_p5 = scmp.lt.s32.totalorder %s622_s17, %s616_s21 }
  0x25   : > { %p619_p2 = pneg %p618_p1  ;;  %p625_p6 = por %p624_p5, %p623_p4 }
  0x27   : > { %p626_p7 = pnand %p625_p6, %p619_p2 }
  0x93   : > { %v254_v6 = vpop.permute.xlu0 %253 }
  0x97   : > { %v340_v12 = vpop.permute.xlu0 %339 }
  0xf3   : > { %v330_v7 = vpop.f32.mrb[0].mxu0 }
  0xf4   : > { %v331_v8 = vadd.f32 %v330_v7, %v254_v6  ;;  %v535_v9 = vpop.f32.mrb[1].mxu0 }
  0xf6   : > { %v334_v10 = vmax.f32 %v331_v8, 0.0 }
  0xf8   : > { %537 = vmatpush3.msra.mxu1 %v334_v10 }
  0xf9   : > { %539 = vmatmul.mubr.msk.f32.vlgmr.msra.gmra.mrb[0].mxu1 %vm342_vm3, %v335_v11 }
 0x1cc   : > { %v412_v13 = vpop.f32.mrb[0].mxu1 }
 0x1cd   : > { %v413_v14 = vadd.f32 %v412_v13, %v340_v12  ;;  %v540_v15 = vpop.f32.mrb[1].mxu1 }
 0x1cf   : > { %416 = vst [vmem:[%s239_s8] sm:$0xf] %v413_v14 }
 0x1d0   : > { %629 = shalt.err (!%p626_p7)
}
 0x1d1   : > { %s630_s16 = scalar_lea.hbm %s842_s13, 64  ;;  %s634_s30 = scalar_lea.hbm %s900_s5, 256 }
 0x1d2   : > { %p631_p9 = scmp.ne.s32.totalorder %s842_s13, %s630_s16  ;;  %p635_p12 = scmp.lt.u32.totalorder %s842_s13, %s900_s5 }
 0x1d3   : > { %p636_p13 = scmp.lt.u32.totalorder %s634_s30, %s630_s16  ;;  %p638_p1 = scmp.lt.u32.totalorder %s630_s16, %s842_s13 }
 0x1d4   : > { %p632_p10 = pnand %p631_p9, %p797_p3 }
 0x1d5   : > { %p637_p0 = por %p636_p13, %p635_p12 }
 0x1d6   : > { %p633_p11 = pneg %p632_p10 }
 0x1d7   : > { %p639_p2 = por %p638_p1, %p637_p0 }
 0x1d9   : > { %p640_p4 = pnand %p639_p2, %p633_p11 }
 0x1db   : > { %643 = shalt.err (!%p640_p4)
}
 0x1dc   : > { %541 = dma.vmem_to_hbm [thread:$0]  (%p797_p3), %s844_s9, 64, %s842_s13, %s418_s22  }
 0x1dd PF: > { %p547_p5 = scmp.ge.s32.totalorder %s710_s25, 2  ;;  %s445_s12 = sand.u32 1, %s682_s18  }
 0x1de   : > { %s446_s21 = scalar_lea.sflag [#allocation3], %s445_s12 }
 0x1df   : > { %p544_p6 = pnand %p547_p5, %p806_p8 }
 0x1e1   : > { %677 = dma.done.wait (!%p544_p6), %s446_s21, 64  }
 0x1e2   : > { %679 = vsyncadd (!%p544_p6), %s446_s21, 4294967232  ;;  %s18_s25 = sadd.s32 1, %s710_s25   ;;  %s903_s18 = smov %s686_s19 }
 0x1e3   : > { %p15_p7 = scmp.ge.s32.totalorder %s18_s25, 6   ;;  %s904_s19 = smov %s690_s20 }
 0x1e4   : > { %s905_s20 = smov %s815_s11  ;;  %s906_s21 = smov %s702_s23 }
 0x1e5   : > { %s907_s22 = smov %s706_s24  ;;  %s908_s23 = smov %s911_s28 }
 0x1e6   : > { %s909_s24 = smov %s915_s29  ;;  %17 = sbr.rel (!%p15_p7) target bundleno = 5 (0x5), region = 75 }
 0x1ed   :  { %451 = vsyncpa [#allocation3], 1 }
 0x1ee   :  { %453 = vsyncpa [#allocation3 + $0x1], 1 }

</bundles_post_ra>
